<compile_context>
chip_gen: v5e
topology: v5e:2x2
jax: 0.10.0
libtpu: 0.0.40
codegen_flags: <defaults>
</compile_context>

<pallas_src>
import functools

import jax
import jax.numpy as jnp
import numpy as np
from jax.experimental import pallas as pl
from jax.experimental.pallas import tpu as pltpu


def _round_up(n, m):
    return ((n + m - 1) // m) * m


def momentum_kernel(x_ref, w1_ref, b1_ref, w2_ref, b2_ref, o_ref, v_ref, *,
                    gamma, ts, n_iters, n_functions):
    """Runs the full MomentumNet iteration on one (TB, D) batch tile.

    o_ref doubles as the running x (VMEM-resident state); v_ref is the speed.
    """
    o_ref[...] = x_ref[...]
    v_ref[...] = jnp.zeros_like(v_ref)

    # Folded scalar constants (kept in-kernel; do NOT pre-scale in the wrapper).
    c_fx = ts * (1.0 - gamma)
    g = gamma

    @pl.loop(0, n_iters)
    def _(_):
        # Static unroll over the residual functions: static weight indices,
        # no per-step scalar mod, loads scheduled next to their matmul use.
        for f in range(n_functions):
            x = o_ref[...]
            h = jnp.tanh(
                jnp.dot(x, w1_ref[f], preferred_element_type=jnp.float32)
                + b1_ref[f])
            fx = (jnp.dot(h, w2_ref[f], preferred_element_type=jnp.float32)
                  + b2_ref[f])
            v = g * v_ref[...] + c_fx * fx          # v = gamma*v + f(x)*ts*(1-gamma)
            v_ref[...] = v
            o_ref[...] = (x + ts * v).astype(o_ref.dtype)   # x = x + v*ts


def momentum_net(x, w1, b1, w2, b2, *, gamma, n_iters, ts=1.0, block_b=128):
    B, D = x.shape
    n_functions, _, H = w1.shape

    # Batch tile: multiple of 8 sublanes, capped at block_b; pad B up to a
    # multiple of the tile so every grid step sees a full MXU-sized M.
    tb = min(_round_up(block_b, 8), _round_up(B, 8))
    Bp = _round_up(B, tb)
    xp = jnp.pad(x, ((0, Bp - B), (0, 0))) if Bp != B else x
    grid = (Bp // tb,)

    kernel = functools.partial(
        momentum_kernel,
        gamma=float(gamma), ts=float(ts),
        n_iters=int(n_iters), n_functions=int(n_functions),
    )

    # VMEM budget: resident weights + double-buffered x/out tiles + v scratch.
    itemsize = 4
    weight_bytes = n_functions * (D * H + H + H * D + D) * itemsize
    tile_bytes = (2 * 2 + 1) * tb * D * itemsize
    est = weight_bytes + tile_bytes
    vmem_limit = None
    if est > (32 << 20):
        # Raise the scoped limit instead of shrinking the batch tile
        # (cap at v7x's 64 MiB physical VMEM).
        vmem_limit = min(int(est * 3 // 2), 64 << 20)

    out = pl.pallas_call(
        kernel,
        out_shape=jax.ShapeDtypeStruct((Bp, D), x.dtype),
        grid_spec=pltpu.PrefetchScalarGridSpec(
            num_scalar_prefetch=0,
            grid=grid,
            in_specs=[
                pl.BlockSpec((tb, D), lambda b: (b, 0)),                 # x tile
                pl.BlockSpec((n_functions, D, H), lambda b: (0, 0, 0)),  # W1 (resident)
                pl.BlockSpec((n_functions, 1, H), lambda b: (0, 0, 0)),  # b1
                pl.BlockSpec((n_functions, H, D), lambda b: (0, 0, 0)),  # W2 (resident)
                pl.BlockSpec((n_functions, 1, D), lambda b: (0, 0, 0)),  # b2
            ],
            out_specs=pl.BlockSpec((tb, D), lambda b: (b, 0)),
            scratch_shapes=[pltpu.VMEM((tb, D), jnp.float32)],           # v
        ),
        compiler_params=pltpu.CompilerParams(
            dimension_semantics=("parallel",),   # batch tiles are independent
            vmem_limit_bytes=vmem_limit,
        ),
        input_output_aliases={0: 0},             # write x back in place
    )(xp, w1, b1, w2, b2)

    return out[:B] if Bp != B else out


def momentum_net_ref(x, w1, b1, w2, b2, *, gamma, n_iters, ts=1.0):
    """Pure-JAX reference mirroring the PyTorch forward."""
    v = jnp.zeros_like(x)
    n_functions = w1.shape[0]
    for _ in range(n_iters):
        for f in range(n_functions):
            h = jnp.tanh(x @ w1[f] + b1[f])
            fx = h @ w2[f] + b2[f]
            v = gamma * v + fx * ts * (1.0 - gamma)
            x = x + v * ts
    return x


if __name__ == "__main__":
    # Small but MXU-aligned shapes: lane-dense D, 128-aligned H, two batch tiles.
    B, D, H = 256, 128, 128       # batch, feature dim, hidden dim
    N_FUNCTIONS = 2
    N_ITERS = 3
    GAMMA = 0.9
    TS = 1.0

    key = jax.random.PRNGKey(0)
    kx, k1, k2, k3, k4 = jax.random.split(key, 5)

    x = jax.random.normal(kx, (B, D), dtype=jnp.float32)
    # Deterministic synthetic parameters (per-function stacked along axis 0).
    w1 = 0.1 * jax.random.normal(k1, (N_FUNCTIONS, D, H), dtype=jnp.float32)
    b1 = 0.1 * jax.random.normal(k2, (N_FUNCTIONS, 1, H), dtype=jnp.float32)
    w2 = 0.1 * jax.random.normal(k3, (N_FUNCTIONS, H, D), dtype=jnp.float32)
    b2 = 0.1 * jax.random.normal(k4, (N_FUNCTIONS, 1, D), dtype=jnp.float32)

    # Reference first (the kernel may alias / overwrite its input buffer).
    ref = momentum_net_ref(x, w1, b1, w2, b2, gamma=GAMMA, n_iters=N_ITERS, ts=TS)
    ref = jax.block_until_ready(ref)

    out = momentum_net(x, w1, b1, w2, b2, gamma=GAMMA, n_iters=N_ITERS, ts=TS)
    out = jax.block_until_ready(out)

    np.testing.assert_allclose(np.asarray(out), np.asarray(ref), rtol=1e-4, atol=1e-4)
    print("KERNEL_OK")
</pallas_src>

<mosaic_0001>
module attributes {stable_mosaic.version = 11 : i64} {
  func.func @momentum_kernel(%arg0: i32, %arg1: memref<128x128xf32, #tpu.memory_space<vmem>>, %arg2: memref<2x128x128xf32, #tpu.memory_space<vmem>>, %arg3: memref<2x1x128xf32, #tpu.memory_space<vmem>>, %arg4: memref<2x128x128xf32, #tpu.memory_space<vmem>>, %arg5: memref<2x1x128xf32, #tpu.memory_space<vmem>>, %arg6: memref<128x128xf32, #tpu.memory_space<vmem>>, %arg7: memref<128x128xf32, #tpu.memory_space<vmem>>) attributes {dimension_semantics = [#tpu.dimension_semantics<parallel>], iteration_bounds = array<i64: 2>, scalar_prefetch = 0 : i64, scratch_operands = 1 : i64, tpu.core_type = #tpu.core_type<tc>, window_params = [{transform_indices = @transform_0, window_bounds = array<i64: 128, 128>}, {pipeline_mode = #tpu.pipeline_mode<synchronous>, transform_indices = @transform_1, window_bounds = array<i64: 2, 128, 128>}, {pipeline_mode = #tpu.pipeline_mode<synchronous>, transform_indices = @transform_2, window_bounds = array<i64: 2, 1, 128>}, {pipeline_mode = #tpu.pipeline_mode<synchronous>, transform_indices = @transform_3, window_bounds = array<i64: 2, 128, 128>}, {pipeline_mode = #tpu.pipeline_mode<synchronous>, transform_indices = @transform_4, window_bounds = array<i64: 2, 1, 128>}, {transform_indices = @transform_5, window_bounds = array<i64: 128, 128>}]} {
    %c0 = arith.constant 0 : index
    %c0_0 = arith.constant 0 : index
    %0 = vector.load %arg1[%c0, %c0_0] : memref<128x128xf32, #tpu.memory_space<vmem>>, vector<128x128xf32>
    %c0_1 = arith.constant 0 : index
    %c0_2 = arith.constant 0 : index
    %1 = vector.load %arg6[%c0_1, %c0_2] : memref<128x128xf32, #tpu.memory_space<vmem>>, vector<128x128xf32>
    tpu.vector_store %arg6[%c0_1, %c0_2], %0 {strides = array<i32>} : memref<128x128xf32, #tpu.memory_space<vmem>>, vector<128x128xf32>,
    %cst = arith.constant 0.000000e+00 : f32
    %2 = vector.broadcast %cst : f32 to vector<128x128xf32>
    %c0_3 = arith.constant 0 : index
    %c0_4 = arith.constant 0 : index
    %3 = vector.load %arg7[%c0_3, %c0_4] : memref<128x128xf32, #tpu.memory_space<vmem>>, vector<128x128xf32>
    tpu.vector_store %arg7[%c0_3, %c0_4], %2 {strides = array<i32>} : memref<128x128xf32, #tpu.memory_space<vmem>>, vector<128x128xf32>,
    %c0_i32 = arith.constant 0 : i32
    %c3_i32 = arith.constant 3 : i32
    %4 = arith.addi %c0_i32, %c3_i32 : i32
    %c1_i32 = arith.constant 1 : i32
    scf.for %arg8 = %c0_i32 to %4 step %c1_i32  : i32 {
      %c0_5 = arith.constant 0 : index
      %c0_6 = arith.constant 0 : index
      %5 = vector.load %arg6[%c0_5, %c0_6] : memref<128x128xf32, #tpu.memory_space<vmem>>, vector<128x128xf32>
      %c0_7 = arith.constant 0 : index
      %c0_8 = arith.constant 0 : index
      %c0_9 = arith.constant 0 : index
      %6 = vector.load %arg2[%c0_7, %c0_8, %c0_9] : memref<2x128x128xf32, #tpu.memory_space<vmem>>, vector<1x128x128xf32>
      %7 = vector.shape_cast %6 : vector<1x128x128xf32> to vector<128x128xf32>
      %cst_10 = arith.constant dense<0.000000e+00> : vector<128x128xf32>
      %8 = tpu.matmul %5, %7, %cst_10 {dimension_numbers = #tpu.dot_dimension_numbers<[1], [0], [0], [1], [0, 0, 1, 1], [], []>} : vector<128x128xf32>, vector<128x128xf32>, vector<128x128xf32> -> vector<128x128xf32>
      %c0_11 = arith.constant 0 : index
      %c0_12 = arith.constant 0 : index
      %c0_13 = arith.constant 0 : index
      %9 = vector.load %arg3[%c0_11, %c0_12, %c0_13] : memref<2x1x128xf32, #tpu.memory_space<vmem>>, vector<1x1x128xf32>
      %10 = vector.shape_cast %9 : vector<1x1x128xf32> to vector<1x128xf32>
      %11 = vector.broadcast %10 : vector<1x128xf32> to vector<128x128xf32>
      %12 = arith.addf %8, %11 : vector<128x128xf32>
      %13 = math.tanh %12 : vector<128x128xf32>
      %c0_14 = arith.constant 0 : index
      %c0_15 = arith.constant 0 : index
      %c0_16 = arith.constant 0 : index
      %14 = vector.load %arg4[%c0_14, %c0_15, %c0_16] : memref<2x128x128xf32, #tpu.memory_space<vmem>>, vector<1x128x128xf32>
      %15 = vector.shape_cast %14 : vector<1x128x128xf32> to vector<128x128xf32>
      %cst_17 = arith.constant dense<0.000000e+00> : vector<128x128xf32>
      %16 = tpu.matmul %13, %15, %cst_17 {dimension_numbers = #tpu.dot_dimension_numbers<[1], [0], [0], [1], [0, 0, 1, 1], [], []>} : vector<128x128xf32>, vector<128x128xf32>, vector<128x128xf32> -> vector<128x128xf32>
      %c0_18 = arith.constant 0 : index
      %c0_19 = arith.constant 0 : index
      %c0_20 = arith.constant 0 : index
      %17 = vector.load %arg5[%c0_18, %c0_19, %c0_20] : memref<2x1x128xf32, #tpu.memory_space<vmem>>, vector<1x1x128xf32>
      %18 = vector.shape_cast %17 : vector<1x1x128xf32> to vector<1x128xf32>
      %19 = vector.broadcast %18 : vector<1x128xf32> to vector<128x128xf32>
      %20 = arith.addf %16, %19 : vector<128x128xf32>
      %c0_21 = arith.constant 0 : index
      %c0_22 = arith.constant 0 : index
      %21 = vector.load %arg7[%c0_21, %c0_22] : memref<128x128xf32, #tpu.memory_space<vmem>>, vector<128x128xf32>
      %cst_23 = arith.constant 0.899999976 : f32
      %22 = vector.broadcast %cst_23 : f32 to vector<128x128xf32>
      %23 = arith.mulf %22, %21 : vector<128x128xf32>
      %cst_24 = arith.constant 1.000000e-01 : f32
      %24 = vector.broadcast %cst_24 : f32 to vector<128x128xf32>
      %25 = arith.mulf %24, %20 : vector<128x128xf32>
      %26 = arith.addf %23, %25 : vector<128x128xf32>
      %c0_25 = arith.constant 0 : index
      %c0_26 = arith.constant 0 : index
      %27 = vector.load %arg7[%c0_25, %c0_26] : memref<128x128xf32, #tpu.memory_space<vmem>>, vector<128x128xf32>
      tpu.vector_store %arg7[%c0_25, %c0_26], %26 {strides = array<i32>} : memref<128x128xf32, #tpu.memory_space<vmem>>, vector<128x128xf32>,
      %cst_27 = arith.constant 1.000000e+00 : f32
      %28 = vector.broadcast %cst_27 : f32 to vector<128x128xf32>
      %29 = arith.mulf %28, %26 : vector<128x128xf32>
      %30 = arith.addf %5, %29 : vector<128x128xf32>
      %c0_28 = arith.constant 0 : index
      %c0_29 = arith.constant 0 : index
      %31 = vector.load %arg6[%c0_28, %c0_29] : memref<128x128xf32, #tpu.memory_space<vmem>>, vector<128x128xf32>
      tpu.vector_store %arg6[%c0_28, %c0_29], %30 {strides = array<i32>} : memref<128x128xf32, #tpu.memory_space<vmem>>, vector<128x128xf32>,
      %c0_30 = arith.constant 0 : index
      %c0_31 = arith.constant 0 : index
      %32 = vector.load %arg6[%c0_30, %c0_31] : memref<128x128xf32, #tpu.memory_space<vmem>>, vector<128x128xf32>
      %c1 = arith.constant 1 : index
      %c0_32 = arith.constant 0 : index
      %c0_33 = arith.constant 0 : index
      %33 = vector.load %arg2[%c1, %c0_32, %c0_33] : memref<2x128x128xf32, #tpu.memory_space<vmem>>, vector<1x128x128xf32>
      %34 = vector.shape_cast %33 : vector<1x128x128xf32> to vector<128x128xf32>
      %cst_34 = arith.constant dense<0.000000e+00> : vector<128x128xf32>
      %35 = tpu.matmul %32, %34, %cst_34 {dimension_numbers = #tpu.dot_dimension_numbers<[1], [0], [0], [1], [0, 0, 1, 1], [], []>} : vector<128x128xf32>, vector<128x128xf32>, vector<128x128xf32> -> vector<128x128xf32>
      %c1_35 = arith.constant 1 : index
      %c0_36 = arith.constant 0 : index
      %c0_37 = arith.constant 0 : index
      %36 = vector.load %arg3[%c1_35, %c0_36, %c0_37] : memref<2x1x128xf32, #tpu.memory_space<vmem>>, vector<1x1x128xf32>
      %37 = vector.shape_cast %36 : vector<1x1x128xf32> to vector<1x128xf32>
      %38 = vector.broadcast %37 : vector<1x128xf32> to vector<128x128xf32>
      %39 = arith.addf %35, %38 : vector<128x128xf32>
      %40 = math.tanh %39 : vector<128x128xf32>
      %c1_38 = arith.constant 1 : index
      %c0_39 = arith.constant 0 : index
      %c0_40 = arith.constant 0 : index
      %41 = vector.load %arg4[%c1_38, %c0_39, %c0_40] : memref<2x128x128xf32, #tpu.memory_space<vmem>>, vector<1x128x128xf32>
      %42 = vector.shape_cast %41 : vector<1x128x128xf32> to vector<128x128xf32>
      %cst_41 = arith.constant dense<0.000000e+00> : vector<128x128xf32>
      %43 = tpu.matmul %40, %42, %cst_41 {dimension_numbers = #tpu.dot_dimension_numbers<[1], [0], [0], [1], [0, 0, 1, 1], [], []>} : vector<128x128xf32>, vector<128x128xf32>, vector<128x128xf32> -> vector<128x128xf32>
      %c1_42 = arith.constant 1 : index
      %c0_43 = arith.constant 0 : index
      %c0_44 = arith.constant 0 : index
      %44 = vector.load %arg5[%c1_42, %c0_43, %c0_44] : memref<2x1x128xf32, #tpu.memory_space<vmem>>, vector<1x1x128xf32>
      %45 = vector.shape_cast %44 : vector<1x1x128xf32> to vector<1x128xf32>
      %46 = vector.broadcast %45 : vector<1x128xf32> to vector<128x128xf32>
      %47 = arith.addf %43, %46 : vector<128x128xf32>
      %c0_45 = arith.constant 0 : index
      %c0_46 = arith.constant 0 : index
      %48 = vector.load %arg7[%c0_45, %c0_46] : memref<128x128xf32, #tpu.memory_space<vmem>>, vector<128x128xf32>
      %cst_47 = arith.constant 0.899999976 : f32
      %49 = vector.broadcast %cst_47 : f32 to vector<128x128xf32>
      %50 = arith.mulf %49, %48 : vector<128x128xf32>
      %cst_48 = arith.constant 1.000000e-01 : f32
      %51 = vector.broadcast %cst_48 : f32 to vector<128x128xf32>
      %52 = arith.mulf %51, %47 : vector<128x128xf32>
      %53 = arith.addf %50, %52 : vector<128x128xf32>
      %c0_49 = arith.constant 0 : index
      %c0_50 = arith.constant 0 : index
      %54 = vector.load %arg7[%c0_49, %c0_50] : memref<128x128xf32, #tpu.memory_space<vmem>>, vector<128x128xf32>
      tpu.vector_store %arg7[%c0_49, %c0_50], %53 {strides = array<i32>} : memref<128x128xf32, #tpu.memory_space<vmem>>, vector<128x128xf32>,
      %cst_51 = arith.constant 1.000000e+00 : f32
      %55 = vector.broadcast %cst_51 : f32 to vector<128x128xf32>
      %56 = arith.mulf %55, %53 : vector<128x128xf32>
      %57 = arith.addf %32, %56 : vector<128x128xf32>
      %c0_52 = arith.constant 0 : index
      %c0_53 = arith.constant 0 : index
      %58 = vector.load %arg6[%c0_52, %c0_53] : memref<128x128xf32, #tpu.memory_space<vmem>>, vector<128x128xf32>
      tpu.vector_store %arg6[%c0_52, %c0_53], %57 {strides = array<i32>} : memref<128x128xf32, #tpu.memory_space<vmem>>, vector<128x128xf32>,
    }
    return
  }
  func.func @transform_0(%arg0: i32) -> (i32, i32) {
    %c0_i32 = arith.constant 0 : i32
    %c0_i32_0 = arith.constant 0 : i32
    return %arg0, %c0_i32 : i32, i32
  }
  func.func @transform_1(%arg0: i32) -> (i32, i32, i32) {
    %c0_i32 = arith.constant 0 : i32
    %c0_i32_0 = arith.constant 0 : i32
    %c0_i32_1 = arith.constant 0 : i32
    %c0_i32_2 = arith.constant 0 : i32
    return %c0_i32, %c0_i32_0, %c0_i32_1 : i32, i32, i32
  }
  func.func @transform_2(%arg0: i32) -> (i32, i32, i32) {
    %c0_i32 = arith.constant 0 : i32
    %c0_i32_0 = arith.constant 0 : i32
    %c0_i32_1 = arith.constant 0 : i32
    %c0_i32_2 = arith.constant 0 : i32
    return %c0_i32, %c0_i32_0, %c0_i32_1 : i32, i32, i32
  }
  func.func @transform_3(%arg0: i32) -> (i32, i32, i32) {
    %c0_i32 = arith.constant 0 : i32
    %c0_i32_0 = arith.constant 0 : i32
    %c0_i32_1 = arith.constant 0 : i32
    %c0_i32_2 = arith.constant 0 : i32
    return %c0_i32, %c0_i32_0, %c0_i32_1 : i32, i32, i32
  }
  func.func @transform_4(%arg0: i32) -> (i32, i32, i32) {
    %c0_i32 = arith.constant 0 : i32
    %c0_i32_0 = arith.constant 0 : i32
    %c0_i32_1 = arith.constant 0 : i32
    %c0_i32_2 = arith.constant 0 : i32
    return %c0_i32, %c0_i32_0, %c0_i32_1 : i32, i32, i32
  }
  func.func @transform_5(%arg0: i32) -> (i32, i32) {
    %c0_i32 = arith.constant 0 : i32
    %c0_i32_0 = arith.constant 0 : i32
    return %arg0, %c0_i32 : i32, i32
  }
}

</mosaic_0001>

<bundles_post_ra>
// kernel: tpu_custom_call.1
= control target key start
LH: loop header
LB: loop body
LE: loop exit
PB: predicated region body
PF: predicated region fallthrough
CT: control target
= control target key end

     0   :  { %10 = vsyncpa [#allocation4], 0  ;;  %s2164_s0 = inlined_call_operand.hbm [shape: f32[256,128], index: 0, kind: input, shape index: {}, may-alias: {0,5}]   ;;  %s2165_s1 = inlined_call_operand.vmem [shape: f32[2,128,128], index: 1, kind: input, shape index: {}]   ;;  %s2166_s2 = inlined_call_operand.hbm [shape: f32[2,1,128], index: 2, kind: input, shape index: {}]   ;;  %s2167_s3 = inlined_call_operand.vmem [shape: f32[2,128,128], index: 3, kind: input, shape index: {}]   ;;  %s2168_s4 = inlined_call_operand.hbm [shape: f32[2,1,128], index: 4, kind: input, shape index: {}]   ;;  %s2169_s5 = inlined_call_operand.hbm [shape: f32[256,128], index: 5, kind: output, shape index: {}, may-alias: {0,5}]  }
   0x1   :  { %12 = vsyncpa [#allocation4 + $0x1], 0 }
   0x2   :  { %13 = vsyncpa [#allocation7], 0 }
   0x3   :  { %14 = vsyncpa [#allocation5], 0 }
   0x4   :  { %16 = vsyncpa [#allocation5 + $0x1], 0  ;;  %s1490_s18 = smov 0   ;;  %s1492_s19 = smov 0  }
   0x5   :  { %s1494_s20 = smov 0   ;;  %s1496_s21 = smov 0  }
   0x6 LB: > { %s1511_s22 = sadd.s32 4294967295, %s1445_s21   ;;  %s1079_s23 = sadd.s32 4294967294, %s1445_s21   ;;  %s1445_s21 = sphi %s1496_s21, %s2179_s21   ;;  %s1441_s20 = sphi %s1494_s20, %s2178_s20   ;;  %s1437_s19 = sphi %s1492_s19, %s2177_s19   ;;  %s1433_s18 = sphi %s1490_s18, %s2176_s18  }
   0x7   : > { %p42_p0 = scmp.ne.s32.totalorder %s1437_s19, %s1433_s18  ;;  %p43_p1 = scmp.eq.s32.totalorder %s1511_s22, 0 }
   0x8   : > { %p150_p2 = scmp.eq.s32.totalorder %s1511_s22, 1  ;;  %p156_p3 = scmp.eq.s32.totalorder %s1079_s23, 1 }
   0x9   : > { %p1520_p4 = por %p43_p1, %p42_p0  ;;  %p1080_p5 = scmp.ge.s32.totalorder %s1445_s21, 1 }
   0xa   : > { %p1525_p6 = por %p156_p3, %p42_p0  ;;  %p163_p7 = scmp.lt.s32.totalorder %s1445_s21, 3 }
   0xb   : > { %s177_s28 = sshll.u32 %s2166_s2, 4  ;;  %s1451_s30 = smov [#allocation6]   ;;  %s178_s28 = int_to_ptr.hbm [resolvable:$true] %s177_s28 }
   0xc   : > { %p1533_p8 = pnand %p1080_p5, %p163_p7  ;;  %s179_s6 = sshll.u32 %s1451_s30, 4  ;;  %s180_s6 = int_to_ptr.vmem [resolvable:$true] %s179_s6 }
   0xd   : > { %s194_s9 = sshll.u32 %s2168_s4, 4  ;;  %s1452_s10 = smov 16   ;;  %s195_s9 = int_to_ptr.hbm [resolvable:$true] %s194_s9 }
   0xe   : > { %p1143_p9 = pneg %p1533_p8  ;;  %s1453_s11 = smov 1  }
   0xf   : > { %s1454_s12 = smov [#allocation8]   ;;  %s1546_s14 = sadd.s32 1, %s1445_s21  }
  0x10   : > { %p1144_p10 = pnand %p1143_p9, %p43_p1  ;;  %s196_s13 = sshll.u32 %s1454_s12, 4  ;;  %s197_s13 = int_to_ptr.vmem [resolvable:$true] %s196_s13 }
  0x11   : > { %s29_s15 = sadd.s32 1, %s1441_s20  ;;  %s26_s16 = ssub.s32 %s1445_s21, %s1546_s14 }
  0x12   : > { %1146 = dma.hbm_to_vmem [thread:$0]  (!%p1144_p10), %s178_s28, 32, %s180_s6, [#allocation7], %s1452_s10, %s1452_s10, %s1453_s11  }
  0x13   : > { %1149 = dma.hbm_to_vmem [thread:$0]  (!%p1144_p10), %s195_s9, 32, %s197_s13, [#allocation7], %s1452_s10, %s1452_s10, %s1453_s11  }
  0x14   : > { %p36_p12 = scmp.ne.s32.totalorder %s1441_s20, %s1437_s19  ;;  %p27_p13 = scmp.eq.s32.totalorder %s26_s16, 0 }
  0x15   : > { %p37_p0 = scmp.eq.s32.totalorder %s1445_s21, 0  ;;  %p1160_p5 = scmp.lt.s32.totalorder %s1445_s21, 2 }
  0x16   : > { %p1556_p3 = por %p150_p2, %p36_p12  ;;  %s210_s26 = sand.u32 1, %s1441_s20  }
  0x17   : > { %s1562_s23 = scalar_select %p27_p13, %s1441_s20, %s29_s15  }
  0x18   : > { %p38_p7 = por %p37_p0, %p36_p12  ;;  %s1084_s27 = sshll.u32 %s210_s26, 7 }
  0x19   : > { %s1129_s28 = sshll.u32 %s1445_s21, 7  ;;  %s214_s8 = scalar_lea.vmem [#allocation3], %s1084_s27 }
  0x1a   : > { %s219_s7 = scalar_lea.hbm %s2164_s0, %s1129_s28  ;;  %s222_s9 = sshll.u32 %s214_s8, 4  ;;  %s223_s9 = int_to_ptr.vmem [resolvable:$true] %s222_s9 }
  0x1b   : > { %s220_s10 = sshll.u32 %s219_s7, 4  ;;  %p1569_p2 = pnand %p1160_p5, %p38_p7  ;;  %s221_s10 = int_to_ptr.hbm [resolvable:$true] %s220_s10 }
  0x1c   : > { %s211_s12 = scalar_lea.sflag [#allocation4], %s210_s26  ;;  %s1341_s13 = sshra.s32 %s221_s10, 4  ;;  %s1342_s13 = int_to_ptr.hbm [resolvable:$true] %s1341_s13 }
  0x1d   : > { %s1343_s15 = scalar_lea.hbm %s1342_s13, 128  ;;  %p1345_p10 = pneg %p1569_p2 }
  0x1e   : > { %p1344_p9 = scmp.ne.s32.totalorder %s1342_s13, %s1343_s15  ;;  %s1348_s28 = scalar_lea.hbm %s2164_s0, 256 }
  0x1f   : > { %p1349_p0 = scmp.lt.s32.totalorder %s1342_s13, %s2164_s0  ;;  %p1350_p5 = scmp.lt.s32.totalorder %s1348_s28, %s1343_s15 }
  0x20   : > { %p1346_p12 = pnand %p1345_p10, %p1344_p9 }
  0x21   : > { %p1351_p7 = por %p1350_p5, %p1349_p0 }
  0x22   : > { %p1347_p13 = pneg %p1346_p12 }
  0x24   : > { %p1352_p11 = pnand %p1351_p7, %p1347_p13 }
  0x26   : > { %1355 = shalt.err (!%p1352_p11)
}
  0x27   : > { %s1455_s26 = smov 128   ;;  %s1456_s7 = smov 8  }
  0x28   : > { %1153 = dma.hbm_to_vmem [thread:$0]  (!%p1569_p2), %s221_s10, 2048, %s223_s9, %s211_s12, %s1455_s26, %s1455_s26, %s1456_s7  }
  0x29   : > { %234 = sbr.rel (%p1533_p8) target bundleno = 788 (0x314), region = 40  ;;  %s1586_s8 = sand.u32 (!%p1533_p8), 1, %s1437_s19  }
  0x2a   : > { %s1088_s16 = sshll.u32 (!%p1533_p8), %s1586_s8, 7  ;;  %s237_s13 = scalar_lea.sflag (!%p1533_p8), [#allocation4], %s1586_s8 }
  0x2b   : > { %s1590_s15 = scalar_lea.vmem (!%p1533_p8), [#allocation3], %s1088_s16 }
  0x2e   : > { %1420 = dma.done.wait (%p1520_p4), %s237_s13, 2048  }
  0x2f   : > { %1422 = vsyncadd (%p1520_p4), %s237_s13, 4294965248 }
  0x30   : > { %1424 = dma.done.wait (%p43_p1), [#allocation7], 64  }
  0x31   : > { %1426 = vsyncadd (%p43_p1), [#allocation7], 4294967232  ;;  %v1457_v0 = vmov 0.0   ;;  %v280_v1 = vld [vmem:[%s1590_s15] sm:$0xff]  ;;  %v281_v2 = vld [vmem:[%s1590_s15 + $0x8] sm:$0xff]  ;;  %s1603_s24 = scalar_lea.vmem [#allocation9], %s1088_s16 }
  0x32   : > { %312 = vst [vmem:[#allocation2 + $0x30] sm:$0xff] %v1457_v0  ;;  %v282_v3 = vld [vmem:[%s1590_s15 + $0x10] sm:$0xff]  ;;  %v283_v4 = vld [vmem:[%s1590_s15 + $0x18] sm:$0xff]  ;;  %v284_v5 = vld [vmem:[%s1590_s15 + $0x20] sm:$0xff]  ;;  %s1634_s29 = smov 0  }
  0x33   : > { %313 = vst [vmem:[#allocation2] sm:$0xff] %v1457_v0  ;;  %v285_v6 = vld [vmem:[%s1590_s15 + $0x28] sm:$0xff]  ;;  %v286_v7 = vld [vmem:[%s1590_s15 + $0x30] sm:$0xff]  ;;  %v287_v8 = vld [vmem:[%s1590_s15 + $0x38] sm:$0xff] }
  0x34   : > { %314 = vst [vmem:[#allocation2 + $0x58] sm:$0xff] %v1457_v0  ;;  %v288_v9 = vld [vmem:[%s1590_s15 + $0x40] sm:$0xff]  ;;  %v289_v10 = vld [vmem:[%s1590_s15 + $0x48] sm:$0xff]  ;;  %v290_v11 = vld [vmem:[%s1590_s15 + $0x50] sm:$0xff] }
  0x35   : > { %315 = vst [vmem:[#allocation2 + $0x18] sm:$0xff] %v1457_v0  ;;  %v291_v12 = vld [vmem:[%s1590_s15 + $0x58] sm:$0xff]  ;;  %v292_v13 = vld [vmem:[%s1590_s15 + $0x60] sm:$0xff]  ;;  %v293_v14 = vld [vmem:[%s1590_s15 + $0x68] sm:$0xff] }
  0x36   : > { %316 = vst [vmem:[#allocation2 + $0x50] sm:$0xff] %v1457_v0  ;;  %v294_v15 = vld [vmem:[%s1590_s15 + $0x70] sm:$0xff]  ;;  %v295_v16 = vld [vmem:[%s1590_s15 + $0x78] sm:$0xff] }
  0x37   : > { %317 = vst [vmem:[#allocation2 + $0x68] sm:$0xff] %v1457_v0 }
  0x38   : > { %318 = vst [vmem:[#allocation2 + $0x8] sm:$0xff] %v1457_v0 }
  0x39   : > { %296 = vst [vmem:[%s1603_s24] sm:$0xff] %v280_v1 }
  0x3a   : > { %297 = vst [vmem:[%s1603_s24 + $0x8] sm:$0xff] %v281_v2 }
  0x3b   : > { %298 = vst [vmem:[%s1603_s24 + $0x10] sm:$0xff] %v282_v3 }
  0x3c   : > { %299 = vst [vmem:[%s1603_s24 + $0x18] sm:$0xff] %v283_v4 }
  0x3d   : > { %300 = vst [vmem:[%s1603_s24 + $0x20] sm:$0xff] %v284_v5 }
  0x3e   : > { %301 = vst [vmem:[%s1603_s24 + $0x28] sm:$0xff] %v285_v6 }
  0x3f   : > { %302 = vst [vmem:[%s1603_s24 + $0x30] sm:$0xff] %v286_v7 }
  0x40   : > { %303 = vst [vmem:[%s1603_s24 + $0x38] sm:$0xff] %v287_v8 }
  0x41   : > { %304 = vst [vmem:[%s1603_s24 + $0x40] sm:$0xff] %v288_v9 }
  0x42   : > { %305 = vst [vmem:[%s1603_s24 + $0x48] sm:$0xff] %v289_v10 }
  0x43   : > { %306 = vst [vmem:[%s1603_s24 + $0x50] sm:$0xff] %v290_v11 }
  0x44   : > { %307 = vst [vmem:[%s1603_s24 + $0x58] sm:$0xff] %v291_v12 }
  0x45   : > { %308 = vst [vmem:[%s1603_s24 + $0x60] sm:$0xff] %v292_v13 }
  0x46   : > { %309 = vst [vmem:[%s1603_s24 + $0x68] sm:$0xff] %v293_v14 }
  0x47   : > { %310 = vst [vmem:[%s1603_s24 + $0x70] sm:$0xff] %v294_v15 }
  0x48   : > { %311 = vst [vmem:[%s1603_s24 + $0x78] sm:$0xff] %v295_v16 }
  0x49   : > { %319 = vst [vmem:[#allocation2 + $0x48] sm:$0xff] %v1457_v0 }
  0x4a   : > { %320 = vst [vmem:[#allocation2 + $0x40] sm:$0xff] %v1457_v0 }
  0x4b   : > { %321 = vst [vmem:[#allocation2 + $0x20] sm:$0xff] %v1457_v0 }
  0x4c   : > { %322 = vst [vmem:[#allocation2 + $0x10] sm:$0xff] %v1457_v0 }
  0x4d   : > { %323 = vst [vmem:[#allocation2 + $0x38] sm:$0xff] %v1457_v0 }
  0x4e   : > { %324 = vst [vmem:[#allocation2 + $0x60] sm:$0xff] %v1457_v0 }
  0x4f   : > { %325 = vst [vmem:[#allocation2 + $0x70] sm:$0xff] %v1457_v0 }
  0x50   : > { %326 = vst [vmem:[#allocation2 + $0x78] sm:$0xff] %v1457_v0 }
  0x51   : > { %327 = vst [vmem:[#allocation2 + $0x28] sm:$0xff] %v1457_v0 }
  0x52 LB: >> { %v365_v17 = vld [vmem:[%s2165_s1 + $0x78] sm:$0xff]  ;;  %v364_v18 = vld [vmem:[%s2165_s1 + $0x70] sm:$0xff]  ;;  %v363_v19 = vld [vmem:[%s2165_s1 + $0x68] sm:$0xff]  ;;  %s333_s29 = sadd.s32 1, %s1449_s29   ;;  %s1449_s29 = sphi %s1634_s29, %s333_s29  }
  0x53   : >> { %370 = vmatpush.msra.mxu0 %v365_v17  ;;  %v362_v20 = vld [vmem:[%s2165_s1 + $0x60] sm:$0xff]  ;;  %v361_v21 = vld [vmem:[%s2165_s1 + $0x58] sm:$0xff]  ;;  %v360_v22 = vld [vmem:[%s2165_s1 + $0x50] sm:$0xff]  ;;  %p330_p1 = scmp.ge.s32.totalorder %s333_s29, 3  }
  0x54   : >> { %v359_v23 = vld [vmem:[%s2165_s1 + $0x48] sm:$0xff]  ;;  %v358_v24 = vld [vmem:[%s2165_s1 + $0x40] sm:$0xff]  ;;  %v357_v25 = vld [vmem:[%s2165_s1 + $0x38] sm:$0xff]  ;;  %s1130_s13 = sshll.u32 (%p330_p1), %s1511_s22, 7  ;;  %s979_s11 = sshll.u32 (%p330_p1), %s1603_s24, 4  ;;  %s980_s11 = int_to_ptr.vmem [resolvable:$true] %s979_s11 }
  0x55   : >> { %371 = vmatpush.msra.mxu0 %v364_v18  ;;  %v356_v26 = vld [vmem:[%s2165_s1 + $0x30] sm:$0xff]  ;;  %v355_v27 = vld [vmem:[%s2165_s1 + $0x28] sm:$0xff]  ;;  %v354_v28 = vld [vmem:[%s2165_s1 + $0x20] sm:$0xff]  ;;  %s978_s10 = scalar_lea.hbm (%p330_p1), %s2169_s5, %s1130_s13  ;;  %s967_s27 = scalar_lea.sflag (%p330_p1), [#allocation5], %s1586_s8 }
  0x56   : >> { %v353_v29 = vld [vmem:[%s2165_s1 + $0x18] sm:$0xff]  ;;  %v352_v30 = vld [vmem:[%s2165_s1 + $0x10] sm:$0xff]  ;;  %v351_v31 = vld [vmem:[%s2165_s1 + $0x8] sm:$0xff]  ;;  %s981_s12 = sshll.u32 (%p330_p1), %s978_s10, 4  ;;  %s1391_s22 = scalar_lea.hbm (%p330_p1), %s2169_s5, 256  ;;  %s982_s12 = int_to_ptr.hbm [resolvable:$true] %s981_s12 }
  0x57   : >> { %372 = vmatpush.msra.mxu0 %v363_v19  ;;  %v350_v32 = vld [vmem:[%s2165_s1] sm:$0xff]  ;;  %v1692_v34 = vld [vmem:[%s1603_s24 + $0x8] sm:$0xff]  ;;  %v1696_v35 = vld [vmem:[%s1603_s24 + $0x10] sm:$0xff]  ;;  %s1385_s28 = sshra.s32 (%p330_p1), %s982_s12, 4  ;;  %s1386_s28 = int_to_ptr.hbm [resolvable:$true] %s1385_s28 }
  0x58   : >> { %v1688_v33 = vld [vmem:[%s1603_s24] sm:$0xff]  ;;  %v1700_v36 = vld [vmem:[%s1603_s24 + $0x18] sm:$0xff]  ;;  %v1708_v38 = vld [vmem:[%s1603_s24 + $0x28] sm:$0xff]  ;;  %s1387_s30 = scalar_lea.hbm (%p330_p1), %s1386_s28, 128  ;;  %p1392_p2 = scmp.lt.s32.totalorder (%p330_p1), %s1386_s28, %s2169_s5 }
  0x59   : >> { %373 = vmatpush.msra.mxu0 %v362_v20  ;;  %v1704_v37 = vld [vmem:[%s1603_s24 + $0x20] sm:$0xff]  ;;  %v1712_v39 = vld [vmem:[%s1603_s24 + $0x30] sm:$0xff]  ;;  %v1716_v40 = vld [vmem:[%s1603_s24 + $0x38] sm:$0xff]  ;;  %p1388_p4 = scmp.ne.s32.totalorder (%p330_p1), %s1386_s28, %s1387_s30  ;;  %p1393_p9 = scmp.lt.s32.totalorder (%p330_p1), %s1391_s22, %s1387_s30 }
  0x5a   : >> { %v1720_v41 = vld [vmem:[%s1603_s24 + $0x40] sm:$0xff]  ;;  %v1724_v42 = vld [vmem:[%s1603_s24 + $0x48] sm:$0xff]  ;;  %v466_v43 = vld [vmem:[%s2167_s3 + $0x78] sm:$0xff] }
  0x5b   : >> { %374 = vmatpush.msra.mxu0 %v361_v21  ;;  %471 = vmatpush.msra.mxu1 %v466_v43  ;;  %v465_v44 = vld [vmem:[%s2167_s3 + $0x70] sm:$0xff]  ;;  %v464_v45 = vld [vmem:[%s2167_s3 + $0x68] sm:$0xff]  ;;  %v463_v46 = vld [vmem:[%s2167_s3 + $0x60] sm:$0xff]  ;;  %p1389_p8 = pnand (%p330_p1), %p1388_p4, %p1556_p3  ;;  %p1394_p10 = por (%p330_p1), %p1393_p9, %p1392_p2 }
  0x5c   : >> { %v1740_v47 = vld [vmem:[%s1603_s24 + $0x50] sm:$0xff]  ;;  %v460_v50 = vld [vmem:[%s2167_s3 + $0x48] sm:$0xff]  ;;  %v459_v51 = vld [vmem:[%s2167_s3 + $0x40] sm:$0xff] }
  0x5d   : >> { %375 = vmatpush.msra.mxu0 %v360_v22  ;;  %472 = vmatpush.msra.mxu1 %v465_v44  ;;  %v462_v48 = vld [vmem:[%s2167_s3 + $0x58] sm:$0xff]  ;;  %v461_v49 = vld [vmem:[%s2167_s3 + $0x50] sm:$0xff]  ;;  %v456_v55 = vld [vmem:[%s2167_s3 + $0x28] sm:$0xff]  ;;  %p1390_p11 = pneg (%p330_p1), %p1389_p8 }
  0x5e   : >> { %v1756_v52 = vld [vmem:[%s1603_s24 + $0x58] sm:$0xff]  ;;  %v457_v54 = vld [vmem:[%s2167_s3 + $0x30] sm:$0xff]  ;;  %v1769_v56 = vld [vmem:[%s1603_s24 + $0x60] sm:$0xff] }
  0x5f   : >> { %376 = vmatpush.msra.mxu0 %v359_v23  ;;  %473 = vmatpush.msra.mxu1 %v464_v45  ;;  %v458_v53 = vld [vmem:[%s2167_s3 + $0x38] sm:$0xff]  ;;  %v455_v57 = vld [vmem:[%s2167_s3 + $0x20] sm:$0xff]  ;;  %v453_v59 = vld [vmem:[%s2167_s3 + $0x10] sm:$0xff]  ;;  %p1395_p12 = pnand (%p330_p1), %p1394_p10, %p1390_p11 }
  0x60   : >> { %v454_v58 = vld [vmem:[%s2167_s3 + $0x18] sm:$0xff]  ;;  %v452_v60 = vld [vmem:[%s2167_s3 + $0x8] sm:$0xff]  ;;  %v451_v62 = vld [vmem:[%s2167_s3] sm:$0xff] }
  0x61   : >> { %377 = vmatpush.msra.mxu0 %v358_v24  ;;  %474 = vmatpush.msra.mxu1 %v463_v46  ;;  %v1785_v61 = vld [vmem:[%s1603_s24 + $0x68] sm:$0xff]  ;;  %v1792_v63 = vld [vmem:[%s1603_s24 + $0x70] sm:$0xff]  ;;  %v1796_v0 = vld [vmem:[%s1603_s24 + $0x78] sm:$0xff] }
  0x62   : >> { %v1799_v1 = vld [vmem:[#allocation6] ss:$0 sm:$0xff]  ;;  %v1106_v45 = vld [vmem:[%s2165_s1 + $0xf0] sm:$0xff]  ;;  %v1105_v46 = vld [vmem:[%s2165_s1 + $0xe8] sm:$0xff] }
  0x63   : >> { %378 = vmatpush.msra.mxu0 %v357_v25  ;;  %475 = vmatpush.msra.mxu1 %v462_v48  ;;  %v1104_v48 = vld [vmem:[%s2165_s1 + $0xe0] sm:$0xff] }
  0x65   : >> { %379 = vmatpush.msra.mxu0 %v356_v26  ;;  %476 = vmatpush.msra.mxu1 %v461_v49 }
  0x67   : >> { %380 = vmatpush.msra.mxu0 %v355_v27  ;;  %477 = vmatpush.msra.mxu1 %v460_v50  ;;  %v1103_v50 = vld [vmem:[%s2165_s1 + $0xd8] sm:$0xff] }
  0x69   : >> { %381 = vmatpush.msra.mxu0 %v354_v28  ;;  %478 = vmatpush.msra.mxu1 %v459_v51 }
  0x6b   : >> { %382 = vmatpush.msra.mxu0 %v353_v29  ;;  %479 = vmatpush.msra.mxu1 %v458_v53 }
  0x6d   : >> { %383 = vmatpush.msra.mxu0 %v352_v30  ;;  %480 = vmatpush.msra.mxu1 %v457_v54  ;;  %v1102_v54 = vld [vmem:[%s2165_s1 + $0xd0] sm:$0xff] }
  0x6f   : >> { %384 = vmatpush.msra.mxu0 %v351_v31  ;;  %481 = vmatpush.msra.mxu1 %v456_v55  ;;  %v1101_v55 = vld [vmem:[%s2165_s1 + $0xc8] sm:$0xff] }
  0x71   : >> { %385 = vmatpush.msra.mxu0 %v350_v32  ;;  %482 = vmatpush.msra.mxu1 %v455_v57  ;;  %v1107_v32 = vld [vmem:[%s2165_s1 + $0xf8] sm:$0xff]  ;;  %v1100_v57 = vld [vmem:[%s2165_s1 + $0xc0] sm:$0xff] }
  0x72   : >> { %386 = vmatmul.f32.vlgmr.msra.gmra.mxu0 %v1688_v33  ;;  %686 = vmatpush.msra.mxu2 %v1107_v32  ;;  %v538_v32 = vld [vmem:[#allocation2 + $0x58] sm:$0xff] }
  0x73   : >> { %483 = vmatpush.msra.mxu1 %v454_v58 }
  0x74   : >> { %687 = vmatpush.msra.mxu2 %v1106_v45 }
  0x75   : >> { %484 = vmatpush.msra.mxu1 %v453_v59  ;;  %v1099_v59 = vld [vmem:[%s2165_s1 + $0xb8] sm:$0xff] }
  0x76   : >> { %688 = vmatpush.msra.mxu2 %v1105_v46  ;;  %v554_v46 = vmul.f32 0.9, %v538_v32 }
  0x77   : >> { %485 = vmatpush.msra.mxu1 %v452_v60 }
  0x78   : >> { %689 = vmatpush.msra.mxu2 %v1104_v48 }
  0x79   : >> { %486 = vmatpush.msra.mxu1 %v451_v62 }
  0x7a   : >> { %389 = vmatmul.f32.gmra.mxu0 %v1692_v34  ;;  %690 = vmatpush.msra.mxu2 %v1103_v50 }
  0x7c   : >> { %691 = vmatpush.msra.mxu2 %v1102_v54 }
  0x7e   : >> { %692 = vmatpush.msra.mxu2 %v1101_v55 }
  0x80   : >> { %693 = vmatpush.msra.mxu2 %v1100_v57  ;;  %v540_v57 = vld [vmem:[#allocation2 + $0x50] sm:$0xff] }
  0x82   : >> { %392 = vmatmul.f32.gmra.mxu0 %v1696_v35  ;;  %694 = vmatpush.msra.mxu2 %v1099_v59 }
  0x8a   : >> { %395 = vmatmul.f32.gmra.mxu0 %v1700_v36 }
  0x92   : >> { %398 = vmatmul.f32.gmra.mxu0 %v1704_v37 }
  0x9a   : >> { %401 = vmatmul.f32.gmra.mxu0 %v1708_v38 }
  0xa2   : >> { %404 = vmatmul.f32.gmra.mxu0 %v1712_v39 }
  0xaa   : >> { %407 = vmatmul.f32.gmra.mxu0 %v1716_v40 }
  0xb2   : >> { %410 = vmatmul.f32.gmra.mxu0 %v1720_v41 }
  0xba   : >> { %413 = vmatmul.f32.gmra.mxu0 %v1724_v42 }
  0xc2   : >> { %416 = vmatmul.f32.gmra.mxu0 %v1740_v47 }
  0xca   : >> { %419 = vmatmul.f32.gmra.mxu0 %v1756_v52 }
  0xd2   : >> { %422 = vmatmul.f32.gmra.mxu0 %v1769_v56 }
  0xda   : >> { %425 = vmatmul.f32.gmra.mxu0 %v1785_v61 }
  0xe2   : >> { %428 = vmatmul.f32.gmra.mxu0 %v1792_v63 }
  0xea   : >> { %431 = vmatmul.f32.gmra.mxu0 %v1796_v0 }
  0xef   : >> { %v387_v2 = vpop.f32.mrf.mxu0 }
  0xf0   : >> { %v388_v3 = vadd.f32 %v1799_v1, %v387_v2  ;;  %v1098_v2 = vld [vmem:[%s2165_s1 + $0xb0] sm:$0xff] }
  0xf1   : >> { %695 = vmatpush.msra.mxu2 %v1098_v2 }
  0xf2   : >> { %1217 = vtanh.f32 %v388_v3  ;;  %v1097_v3 = vld [vmem:[%s2165_s1 + $0xa8] sm:$0xff] }
  0xf3   : >> { %696 = vmatpush.msra.mxu2 %v1097_v3  ;;  %v541_v3 = vld [vmem:[#allocation2 + $0x68] sm:$0xff] }
  0xf7   : >> { %v390_v4 = vpop.f32.mrf.mxu0 }
  0xf8   : >> { %v1218_v5 = vpop.eup %1217  ;;  %v391_v6 = vadd.f32 %v1799_v1, %v390_v4  ;;  %v1096_v4 = vld [vmem:[%s2165_s1 + $0xa0] sm:$0xff] }
  0xf9   : >> { %487 = vmatmul.f32.vlgmr.msra.gmra.mxu1 %v1218_v5  ;;  %697 = vmatpush.msra.mxu2 %v1096_v4 }
  0xfa   : >> { %1219 = vtanh.f32 %v391_v6  ;;  %v1095_v6 = vld [vmem:[%s2165_s1 + $0x98] sm:$0xff] }
  0xfb   : >> { %698 = vmatpush.msra.mxu2 %v1095_v6 }
  0xff   : >> { %v393_v7 = vpop.f32.mrf.mxu0 }
 0x100   : >> { %v1220_v8 = vpop.eup %1219  ;;  %v394_v9 = vadd.f32 %v1799_v1, %v393_v7 }
 0x101   : >> { %490 = vmatmul.f32.gmra.mxu1 %v1220_v8 }
 0x102   : >> { %1221 = vtanh.f32 %v394_v9  ;;  %v1094_v9 = vld [vmem:[%s2165_s1 + $0x90] sm:$0xff] }
 0x103   : >> { %699 = vmatpush.msra.mxu2 %v1094_v9  ;;  %v542_v9 = vld [vmem:[#allocation2 + $0x8] sm:$0xff] }
 0x107   : >> { %v396_v10 = vpop.f32.mrf.mxu0 }
 0x108   : >> { %v1222_v11 = vpop.eup %1221  ;;  %v397_v12 = vadd.f32 %v1799_v1, %v396_v10  ;;  %v1093_v10 = vld [vmem:[%s2165_s1 + $0x88] sm:$0xff] }
 0x109   : >> { %493 = vmatmul.f32.gmra.mxu1 %v1222_v11  ;;  %700 = vmatpush.msra.mxu2 %v1093_v10  ;;  %v1092_v11 = vld [vmem:[%s2165_s1 + $0x80] sm:$0xff] }
 0x10a   : >> { %1223 = vtanh.f32 %v397_v12 }
 0x10b   : >> { %701 = vmatpush.msra.mxu2 %v1092_v11 }
 0x10f   : >> { %v399_v13 = vpop.f32.mrf.mxu0 }
 0x110   : >> { %v1224_v14 = vpop.eup %1223  ;;  %v400_v15 = vadd.f32 %v1799_v1, %v399_v13 }
 0x111   : >> { %496 = vmatmul.f32.gmra.mxu1 %v1224_v14 }
 0x112   : >> { %1225 = vtanh.f32 %v400_v15 }
 0x117   : >> { %v402_v16 = vpop.f32.mrf.mxu0 }
 0x118   : >> { %v1226_v17 = vpop.eup %1225  ;;  %v403_v18 = vadd.f32 %v1799_v1, %v402_v16 }
 0x119   : >> { %499 = vmatmul.f32.gmra.mxu1 %v1226_v17 }
 0x11a   : >> { %1227 = vtanh.f32 %v403_v18 }
 0x11f   : >> { %v405_v19 = vpop.f32.mrf.mxu0 }
 0x120   : >> { %v1228_v20 = vpop.eup %1227  ;;  %v406_v21 = vadd.f32 %v1799_v1, %v405_v19  ;;  %v1865_v19 = vld [vmem:[#allocation8] ss:$0 sm:$0xff] }
 0x121   : >> { %502 = vmatmul.f32.gmra.mxu1 %v1228_v20  ;;  %v536_v20 = vld [vmem:[#allocation2 + $0x30] sm:$0xff] }
 0x122   : >> { %1229 = vtanh.f32 %v406_v21 }
 0x127   : >> { %v408_v22 = vpop.f32.mrf.mxu0 }
 0x128   : >> { %v1230_v23 = vpop.eup %1229  ;;  %v409_v24 = vadd.f32 %v1799_v1, %v408_v22 }
 0x129   : >> { %505 = vmatmul.f32.gmra.mxu1 %v1230_v23  ;;  %v552_v23 = vmul.f32 0.9, %v536_v20 }
 0x12a   : >> { %1231 = vtanh.f32 %v409_v24 }
 0x12f   : >> { %v411_v25 = vpop.f32.mrf.mxu0 }
 0x130   : >> { %v1232_v26 = vpop.eup %1231  ;;  %v412_v27 = vadd.f32 %v1799_v1, %v411_v25 }
 0x131   : >> { %508 = vmatmul.f32.gmra.mxu1 %v1232_v26  ;;  %v537_v26 = vld [vmem:[#allocation2] sm:$0xff] }
 0x132   : >> { %1233 = vtanh.f32 %v412_v27 }
 0x137   : >> { %v414_v28 = vpop.f32.mrf.mxu0 }
 0x138   : >> { %v1234_v29 = vpop.eup %1233  ;;  %v415_v30 = vadd.f32 %v1799_v1, %v414_v28 }
 0x139   : >> { %511 = vmatmul.f32.gmra.mxu1 %v1234_v29  ;;  %v553_v29 = vmul.f32 0.9, %v537_v26 }
 0x13a   : >> { %1235 = vtanh.f32 %v415_v30 }
 0x13f   : >> { %v417_v31 = vpop.f32.mrf.mxu0 }
 0x140   : >> { %v1236_v43 = vpop.eup %1235  ;;  %v418_v44 = vadd.f32 %v1799_v1, %v417_v31 }
 0x141   : >> { %514 = vmatmul.f32.gmra.mxu1 %v1236_v43 }
 0x142   : >> { %1237 = vtanh.f32 %v418_v44 }
 0x147   : >> { %v420_v49 = vpop.f32.mrf.mxu0 }
 0x148   : >> { %v1238_v51 = vpop.eup %1237  ;;  %v421_v53 = vadd.f32 %v1799_v1, %v420_v49  ;;  %v539_v49 = vld [vmem:[#allocation2 + $0x18] sm:$0xff] }
 0x149   : >> { %517 = vmatmul.f32.gmra.mxu1 %v1238_v51  ;;  %v555_v54 = vmul.f32 0.9, %v539_v49 }
 0x14a   : >> { %1239 = vtanh.f32 %v421_v53 }
 0x14f   : >> { %v423_v58 = vpop.f32.mrf.mxu0 }
 0x150   : >> { %v1240_v60 = vpop.eup %1239  ;;  %v424_v62 = vadd.f32 %v1799_v1, %v423_v58 }
 0x151   : >> { %520 = vmatmul.f32.gmra.mxu1 %v1240_v60 }
 0x152   : >> { %1241 = vtanh.f32 %v424_v62  ;;  %v556_v62 = vmul.f32 0.9, %v540_v57  ;;  %v547_v57 = vld [vmem:[#allocation2 + $0x38] sm:$0xff] }
 0x157   : >> { %v426_v5 = vpop.f32.mrf.mxu0 }
 0x158   : >> { %v1242_v7 = vpop.eup %1241  ;;  %v427_v8 = vadd.f32 %v1799_v1, %v426_v5 }
 0x159   : >> { %523 = vmatmul.f32.gmra.mxu1 %v1242_v7  ;;  %v557_v7 = vmul.f32 0.9, %v541_v3  ;;  %v563_v3 = vmul.f32 0.9, %v547_v57 }
 0x15a   : >> { %1243 = vtanh.f32 %v427_v8 }
 0x15f   : >> { %v429_v12 = vpop.f32.mrf.mxu0 }
 0x160   : >> { %v1244_v13 = vpop.eup %1243  ;;  %v430_v14 = vadd.f32 %v1799_v1, %v429_v12 }
 0x161   : >> { %526 = vmatmul.f32.gmra.mxu1 %v1244_v13  ;;  %v558_v13 = vmul.f32 0.9, %v542_v9  ;;  %v1119_v9 = vld [vmem:[%s2167_s3 + $0xd8] sm:$0xff] }
 0x162   : >> { %1245 = vtanh.f32 %v430_v14 }
 0x167   : >> { %v432_v15 = vpop.f32.mrf.mxu0 }
 0x168   : >> { %v1246_v16 = vpop.eup %1245  ;;  %v433_v17 = vadd.f32 %v1799_v1, %v432_v15  ;;  %v543_v15 = vld [vmem:[#allocation2 + $0x48] sm:$0xff] }
 0x169   : >> { %529 = vmatmul.f32.gmra.mxu1 %v1246_v16  ;;  %v559_v20 = vmul.f32 0.9, %v543_v15 }
 0x16a   : >> { %1247 = vtanh.f32 %v433_v17 }
 0x170   : >> { %v1248_v18 = vpop.eup %1247 }
 0x171   : >> { %532 = vmatmul.f32.gmra.mxu1 %v1248_v18 }
 0x176   : >> { %v488_v21 = vpop.f32.mrf.mxu1 }
 0x177   : >> { %v489_v22 = vadd.f32 %v1865_v19, %v488_v21 }
 0x179   : >> { %v568_v24 = vmul.f32 0.1, %v489_v22  ;;  %v544_v22 = vld [vmem:[#allocation2 + $0x40] sm:$0xff] }
 0x17b   : >> { %v1868_v25 = vadd.f32 %v568_v24, %v552_v23 }
 0x17d   : >> { %v1872_v27 = vadd.f32 %v1868_v25, %v1688_v33 }
 0x17e   : >> { %v491_v1 = vpop.f32.mrf.mxu1 }
 0x17f   : >> { %v492_v28 = vadd.f32 %v1865_v19, %v491_v1  ;;  %702 = vmatmul.f32.vlgmr.msra.gmra.mxu2 %v1872_v27  ;;  %v560_v1 = vmul.f32 0.9, %v544_v22  ;;  %v549_v22 = vld [vmem:[#allocation2 + $0x70] sm:$0xff] }
 0x181   : >> { %v569_v30 = vmul.f32 0.1, %v492_v28 }
 0x183   : >> { %v1876_v31 = vadd.f32 %v569_v30, %v553_v29  ;;  %v545_v29 = vld [vmem:[#allocation2 + $0x20] sm:$0xff] }
 0x185   : >> { %v1880_v43 = vadd.f32 %v1876_v31, %v1692_v34 }
 0x186   : >> { %v494_v44 = vpop.f32.mrf.mxu1 }
 0x187   : >> { %v495_v45 = vadd.f32 %v1865_v19, %v494_v44  ;;  %705 = vmatmul.f32.gmra.mxu2 %v1880_v43 }
 0x189   : >> { %v570_v33 = vmul.f32 0.1, %v495_v45  ;;  %v561_v45 = vmul.f32 0.9, %v545_v29 }
 0x18b   : >> { %v1884_v48 = vadd.f32 %v570_v33, %v554_v46  ;;  %v546_v33 = vld [vmem:[#allocation2 + $0x10] sm:$0xff] }
 0x18d   : >> { %v1888_v50 = vadd.f32 %v1884_v48, %v1696_v35 }
 0x18e   : >> { %v497_v51 = vpop.f32.mrf.mxu1 }
 0x18f   : >> { %v498_v53 = vadd.f32 %v1865_v19, %v497_v51  ;;  %708 = vmatmul.f32.gmra.mxu2 %v1888_v50 }
 0x191   : >> { %v571_v34 = vmul.f32 0.1, %v498_v53 }
 0x193   : >> { %v1892_v55 = vadd.f32 %v571_v34, %v555_v54  ;;  %v562_v54 = vmul.f32 0.9, %v546_v33  ;;  %v1111_v33 = vld [vmem:[%s2167_s3 + $0x98] sm:$0xff] }
 0x195   : >> { %v1896_v58 = vadd.f32 %v1892_v55, %v1700_v36 }
 0x196   : >> { %v500_v59 = vpop.f32.mrf.mxu1 }
 0x197   : >> { %v501_v60 = vadd.f32 %v1865_v19, %v500_v59  ;;  %711 = vmatmul.f32.gmra.mxu2 %v1896_v58  ;;  %v1123_v59 = vld [vmem:[%s2167_s3 + $0xf8] sm:$0xff] }
 0x198   : >> { %789 = vmatpush.msra.mxu3 %v1123_v59 }
 0x199   : >> { %v572_v35 = vmul.f32 0.1, %v501_v60 }
 0x19b   : >> { %v1900_v2 = vadd.f32 %v572_v35, %v556_v62  ;;  %v1122_v62 = vld [vmem:[%s2167_s3 + $0xf0] sm:$0xff] }
 0x19c   : >> { %790 = vmatpush.msra.mxu3 %v1122_v62 }
 0x19d   : >> { %v1904_v4 = vadd.f32 %v1900_v2, %v1704_v37 }
 0x19e   : >> { %v503_v5 = vpop.f32.mrf.mxu1 }
 0x19f   : >> { %v504_v6 = vadd.f32 %v1865_v19, %v503_v5  ;;  %714 = vmatmul.f32.gmra.mxu2 %v1904_v4  ;;  %v1121_v5 = vld [vmem:[%s2167_s3 + $0xe8] sm:$0xff] }
 0x1a0   : >> { %791 = vmatpush.msra.mxu3 %v1121_v5 }
 0x1a1   : >> { %v573_v36 = vmul.f32 0.1, %v504_v6 }
 0x1a3   : >> { %v1908_v8 = vadd.f32 %v573_v36, %v557_v7  ;;  %v548_v36 = vld [vmem:[#allocation2 + $0x60] sm:$0xff] }
 0x1a4   : >> { %v564_v15 = vmul.f32 0.9, %v548_v36 }
 0x1a5   : >> { %v1912_v10 = vadd.f32 %v1908_v8, %v1708_v38 }
 0x1a6   : >> { %v506_v11 = vpop.f32.mrf.mxu1 }
 0x1a7   : >> { %v507_v12 = vadd.f32 %v1865_v19, %v506_v11  ;;  %717 = vmatmul.f32.gmra.mxu2 %v1912_v10 }
 0x1a9   : >> { %v574_v37 = vmul.f32 0.1, %v507_v12 }
 0x1ab   : >> { %v1916_v14 = vadd.f32 %v574_v37, %v558_v13  ;;  %v1118_v13 = vld [vmem:[%s2167_s3 + $0xd0] sm:$0xff] }
 0x1ad   : >> { %v1920_v16 = vadd.f32 %v1916_v14, %v1712_v39 }
 0x1ae   : >> { %v509_v17 = vpop.f32.mrf.mxu1 }
 0x1af   : >> { %v510_v18 = vadd.f32 %v1865_v19, %v509_v17  ;;  %720 = vmatmul.f32.gmra.mxu2 %v1920_v16  ;;  %v1117_v17 = vld [vmem:[%s2167_s3 + $0xc8] sm:$0xff] }
 0x1b1   : >> { %v575_v38 = vmul.f32 0.1, %v510_v18 }
 0x1b3   : >> { %v1924_v21 = vadd.f32 %v575_v38, %v559_v20  ;;  %v1115_v20 = vld [vmem:[%s2167_s3 + $0xb8] sm:$0xff] }
 0x1b5   : >> { %v1928_v23 = vadd.f32 %v1924_v21, %v1716_v40 }
 0x1b6   : >> { %v512_v24 = vpop.f32.mrf.mxu1 }
 0x1b7   : >> { %v513_v26 = vadd.f32 %v1865_v19, %v512_v24  ;;  %723 = vmatmul.f32.gmra.mxu2 %v1928_v23  ;;  %v1114_v24 = vld [vmem:[%s2167_s3 + $0xb0] sm:$0xff] }
 0x1b9   : >> { %v576_v39 = vmul.f32 0.1, %v513_v26 }
 0x1bb   : >> { %v1932_v28 = vadd.f32 %v576_v39, %v560_v1  ;;  %v1113_v39 = vld [vmem:[%s2167_s3 + $0xa8] sm:$0xff] }
 0x1bd   : >> { %v1936_v30 = vadd.f32 %v1932_v28, %v1720_v41 }
 0x1be   : >> { %v515_v32 = vpop.f32.mrf.mxu1 }
 0x1bf   : >> { %v516_v44 = vadd.f32 %v1865_v19, %v515_v32  ;;  %726 = vmatmul.f32.gmra.mxu2 %v1936_v30  ;;  %v565_v32 = vmul.f32 0.9, %v549_v22 }
 0x1c1   : >> { %v577_v40 = vmul.f32 0.1, %v516_v44 }
 0x1c3   : >> { %v1940_v46 = vadd.f32 %v577_v40, %v561_v45  ;;  %v1112_v45 = vld [vmem:[%s2167_s3 + $0xa0] sm:$0xff]  ;;  %v550_v40 = vld [vmem:[#allocation2 + $0x78] sm:$0xff] }
 0x1c4   : >> { %v566_v59 = vmul.f32 0.9, %v550_v40 }
 0x1c5   : >> { %v1944_v49 = vadd.f32 %v1940_v46, %v1724_v42 }
 0x1c6   : >> { %v518_v51 = vpop.f32.mrf.mxu1 }
 0x1c7   : >> { %v519_v53 = vadd.f32 %v1865_v19, %v518_v51  ;;  %729 = vmatmul.f32.gmra.mxu2 %v1944_v49 }
 0x1c9   : >> { %v578_v41 = vmul.f32 0.1, %v519_v53  ;;  %v1110_v53 = vld [vmem:[%s2167_s3 + $0x90] sm:$0xff] }
 0x1cb   : >> { %v1948_v34 = vadd.f32 %v578_v41, %v562_v54  ;;  %v1109_v41 = vld [vmem:[%s2167_s3 + $0x88] sm:$0xff] }
 0x1cd   : >> { %v1955_v60 = vadd.f32 %v1948_v34, %v1740_v47  ;;  %v1120_v47 = vld [vmem:[%s2167_s3 + $0xe0] sm:$0xff] }
 0x1ce   : >> { %v521_v42 = vpop.f32.mrf.mxu1  ;;  %792 = vmatpush.msra.mxu3 %v1120_v47 }
 0x1cf   : >> { %v522_v35 = vadd.f32 %v1865_v19, %v521_v42  ;;  %732 = vmatmul.f32.gmra.mxu2 %v1955_v60 }
 0x1d0   : >> { %793 = vmatpush.msra.mxu3 %v1119_v9 }
 0x1d1   : >> { %v579_v6 = vmul.f32 0.1, %v522_v35  ;;  %v551_v35 = vld [vmem:[#allocation2 + $0x28] sm:$0xff] }
 0x1d2   : >> { %794 = vmatpush.msra.mxu3 %v1118_v13  ;;  %v567_v47 = vmul.f32 0.9, %v551_v35  ;;  %v2043_v13 = vld [vmem:[#allocation6 + $0x1] ss:$0 sm:$0xff] }
 0x1d3   : >> { %v1968_v7 = vadd.f32 %v579_v6, %v563_v3 }
 0x1d4   : >> { %795 = vmatpush.msra.mxu3 %v1117_v17 }
 0x1d5   : >> { %v1975_v11 = vadd.f32 %v1968_v7, %v1756_v52  ;;  %v1116_v52 = vld [vmem:[%s2167_s3 + $0xc0] sm:$0xff] }
 0x1d6   : >> { %v524_v12 = vpop.f32.mrf.mxu1  ;;  %796 = vmatpush.msra.mxu3 %v1116_v52 }
 0x1d7   : >> { %v525_v37 = vadd.f32 %v1865_v19, %v524_v12  ;;  %735 = vmatmul.f32.gmra.mxu2 %v1975_v11 }
 0x1d8   : >> { %797 = vmatpush.msra.mxu3 %v1115_v20 }
 0x1d9   : >> { %v580_v18 = vmul.f32 0.1, %v525_v37 }
 0x1da   : >> { %798 = vmatpush.msra.mxu3 %v1114_v24 }
 0x1db   : >> { %v1991_v38 = vadd.f32 %v580_v18, %v564_v15 }
 0x1dc   : >> { %799 = vmatpush.msra.mxu3 %v1113_v39 }
 0x1dd   : >> { %v1998_v26 = vadd.f32 %v1991_v38, %v1769_v56 }
 0x1de   : >> { %v527_v1 = vpop.f32.mrf.mxu1  ;;  %800 = vmatpush.msra.mxu3 %v1112_v45 }
 0x1df   : >> { %v528_v29 = vadd.f32 %v1865_v19, %v527_v1  ;;  %738 = vmatmul.f32.gmra.mxu2 %v1998_v26 }
 0x1e0   : >> { %801 = vmatpush.msra.mxu3 %v1111_v33 }
 0x1e1   : >> { %v581_v44 = vmul.f32 0.1, %v528_v29 }
 0x1e2   : >> { %802 = vmatpush.msra.mxu3 %v1110_v53 }
 0x1e3   : >> { %v2008_v56 = vadd.f32 %v581_v44, %v565_v32 }
 0x1e4   : >> { %803 = vmatpush.msra.mxu3 %v1109_v41 }
 0x1e5   : >> { %v2015_v51 = vadd.f32 %v2008_v56, %v1785_v61  ;;  %v1108_v61 = vld [vmem:[%s2167_s3 + $0x80] sm:$0xff] }
 0x1e6   : >> { %v530_v54 = vpop.f32.mrf.mxu1  ;;  %804 = vmatpush.msra.mxu3 %v1108_v61 }
 0x1e7   : >> { %v531_v57 = vadd.f32 %v1865_v19, %v530_v54  ;;  %741 = vmatmul.f32.gmra.mxu2 %v2015_v51 }
 0x1e9   : >> { %v582_v42 = vmul.f32 0.1, %v531_v57 }
 0x1eb   : >> { %v2028_v62 = vadd.f32 %v582_v42, %v566_v59 }
 0x1ed   : >> { %v2032_v3 = vadd.f32 %v2028_v62, %v1792_v63 }
 0x1ee   : >> { %v533_v5 = vpop.f32.mrf.mxu1 }
 0x1ef   : >> { %v534_v6 = vadd.f32 %v1865_v19, %v533_v5  ;;  %744 = vmatmul.f32.gmra.mxu2 %v2032_v3 }
 0x1f1   : >> { %v583_v36 = vmul.f32 0.1, %v534_v6 }
 0x1f3   : >> { %v2036_v9 = vadd.f32 %v583_v36, %v567_v47 }
 0x1f5   : >> { %v2040_v12 = vadd.f32 %v2036_v9, %v1796_v0 }
 0x1f7   : >> { %747 = vmatmul.f32.gmra.mxu2 %v2040_v12 }
 0x202   : >> { %v703_v37 = vpop.f32.mrf.mxu2 }
 0x203   : >> { %v704_v63 = vadd.f32 %v2043_v13, %v703_v37 }
 0x205   : >> { %1249 = vtanh.f32 %v704_v63 }
 0x20a   : >> { %v706_v15 = vpop.f32.mrf.mxu2 }
 0x20b   : >> { %v1250_v19 = vpop.eup %1249  ;;  %v707_v17 = vadd.f32 %v2043_v13, %v706_v15 }
 0x20c   : >> { %805 = vmatmul.f32.vlgmr.msra.gmra.mxu3 %v1250_v19 }
 0x20d   : >> { %1251 = vtanh.f32 %v707_v17 }
 0x212   : >> { %v709_v52 = vpop.f32.mrf.mxu2 }
 0x213   : >> { %v1252_v18 = vpop.eup %1251  ;;  %v710_v20 = vadd.f32 %v2043_v13, %v709_v52 }
 0x214   : >> { %808 = vmatmul.f32.gmra.mxu3 %v1252_v18 }
 0x215   : >> { %1253 = vtanh.f32 %v710_v20 }
 0x21a   : >> { %v712_v0 = vpop.f32.mrf.mxu2 }
 0x21b   : >> { %v1254_v22 = vpop.eup %1253  ;;  %v713_v24 = vadd.f32 %v2043_v13, %v712_v0 }
 0x21c   : >> { %811 = vmatmul.f32.gmra.mxu3 %v1254_v22 }
 0x21d   : >> { %1255 = vtanh.f32 %v713_v24 }
 0x222   : >> { %v715_v1 = vpop.f32.mrf.mxu2 }
 0x223   : >> { %v1256_v39 = vpop.eup %1255  ;;  %v716_v29 = vadd.f32 %v2043_v13, %v715_v1 }
 0x224   : >> { %814 = vmatmul.f32.gmra.mxu3 %v1256_v39 }
 0x225   : >> { %1257 = vtanh.f32 %v716_v29 }
 0x22a   : >> { %v718_v32 = vpop.f32.mrf.mxu2 }
 0x22b   : >> { %v1258_v44 = vpop.eup %1257  ;;  %v719_v45 = vadd.f32 %v2043_v13, %v718_v32 }
 0x22c   : >> { %817 = vmatmul.f32.gmra.mxu3 %v1258_v44 }
 0x22d   : >> { %1259 = vtanh.f32 %v719_v45 }
 0x232   : >> { %v721_v40 = vpop.f32.mrf.mxu2 }
 0x233   : >> { %v1260_v33 = vpop.eup %1259  ;;  %v722_v53 = vadd.f32 %v2043_v13, %v721_v40  ;;  %v2061_v40 = vld [vmem:[#allocation8 + $0x1] ss:$0 sm:$0xff] }
 0x234   : >> { %820 = vmatmul.f32.gmra.mxu3 %v1260_v33 }
 0x235   : >> { %1261 = vtanh.f32 %v722_v53 }
 0x23a   : >> { %v724_v54 = vpop.f32.mrf.mxu2 }
 0x23b   : >> { %v1262_v41 = vpop.eup %1261  ;;  %v725_v57 = vadd.f32 %v2043_v13, %v724_v54  ;;  %v870_v54 = vmul.f32 0.9, %v1868_v25 }
 0x23c   : >> { %823 = vmatmul.f32.gmra.mxu3 %v1262_v41 }
 0x23d   : >> { %1263 = vtanh.f32 %v725_v57 }
 0x242   : >> { %v727_v59 = vpop.f32.mrf.mxu2 }
 0x243   : >> { %v1264_v42 = vpop.eup %1263  ;;  %v728_v61 = vadd.f32 %v2043_v13, %v727_v59 }
 0x244   : >> { %826 = vmatmul.f32.gmra.mxu3 %v1264_v42 }
 0x245   : >> { %1265 = vtanh.f32 %v728_v61  ;;  %v871_v61 = vmul.f32 0.9, %v1876_v31 }
 0x24a   : >> { %v730_v35 = vpop.f32.mrf.mxu2 }
 0x24b   : >> { %v1266_v5 = vpop.eup %1265  ;;  %v731_v6 = vadd.f32 %v2043_v13, %v730_v35 }
 0x24c   : >> { %829 = vmatmul.f32.gmra.mxu3 %v1266_v5 }
 0x24d   : >> { %1267 = vtanh.f32 %v731_v6 }
 0x252   : >> { %v733_v47 = vpop.f32.mrf.mxu2 }
 0x253   : >> { %v1268_v36 = vpop.eup %1267  ;;  %v734_v37 = vadd.f32 %v2043_v13, %v733_v47 }
 0x254   : >> { %832 = vmatmul.f32.gmra.mxu3 %v1268_v36  ;;  %v872_v36 = vmul.f32 0.9, %v1884_v48 }
 0x255   : >> { %1269 = vtanh.f32 %v734_v37 }
 0x25a   : >> { %v736_v63 = vpop.f32.mrf.mxu2 }
 0x25b   : >> { %v1270_v15 = vpop.eup %1269  ;;  %v737_v19 = vadd.f32 %v2043_v13, %v736_v63 }
 0x25c   : >> { %835 = vmatmul.f32.gmra.mxu3 %v1270_v15 }
 0x25d   : >> { %1271 = vtanh.f32 %v737_v19  ;;  %v873_v19 = vmul.f32 0.9, %v1892_v55 }
 0x262   : >> { %v739_v17 = vpop.f32.mrf.mxu2 }
 0x263   : >> { %v1272_v52 = vpop.eup %1271  ;;  %v740_v18 = vadd.f32 %v2043_v13, %v739_v17 }
 0x264   : >> { %838 = vmatmul.f32.gmra.mxu3 %v1272_v52 }
 0x265   : >> { %1273 = vtanh.f32 %v740_v18 }
 0x26a   : >> { %v742_v20 = vpop.f32.mrf.mxu2 }
 0x26b   : >> { %v1274_v0 = vpop.eup %1273  ;;  %v743_v22 = vadd.f32 %v2043_v13, %v742_v20  ;;  %v874_v20 = vmul.f32 0.9, %v1900_v2 }
 0x26c   : >> { %841 = vmatmul.f32.gmra.mxu3 %v1274_v0 }
 0x26d   : >> { %1275 = vtanh.f32 %v743_v22 }
 0x272   : >> { %v745_v24 = vpop.f32.mrf.mxu2 }
 0x273   : >> { %v1276_v1 = vpop.eup %1275  ;;  %v746_v39 = vadd.f32 %v2043_v13, %v745_v24 }
 0x274   : >> { %844 = vmatmul.f32.gmra.mxu3 %v1276_v1  ;;  %v875_v1 = vmul.f32 0.9, %v1908_v8 }
 0x275   : >> { %1277 = vtanh.f32 %v746_v39 }
 0x27a   : >> { %v748_v29 = vpop.f32.mrf.mxu2 }
 0x27b   : >> { %v1278_v32 = vpop.eup %1277  ;;  %v749_v44 = vadd.f32 %v2043_v13, %v748_v29 }
 0x27c   : >> { %847 = vmatmul.f32.gmra.mxu3 %v1278_v32 }
 0x27d   : >> { %1279 = vtanh.f32 %v749_v44  ;;  %v876_v44 = vmul.f32 0.9, %v1916_v14 }
 0x283   : >> { %v1280_v45 = vpop.eup %1279 }
 0x284   : >> { %850 = vmatmul.f32.gmra.mxu3 %v1280_v45 }
 0x28f   : >> { %v806_v33 = vpop.f32.mrf.mxu3 }
 0x290   : >> { %v807_v53 = vadd.f32 %v2061_v40, %v806_v33 }
 0x292   : >> { %v886_v41 = vmul.f32 0.1, %v807_v53 }
 0x294   : >> { %v902_v57 = vadd.f32 %v886_v41, %v870_v54  ;;  %v877_v54 = vmul.f32 0.9, %v1924_v21 }
 0x296   : >> { %918 = vst [vmem:[#allocation2 + $0x30] sm:$0xff] %v902_v57  ;;  %v934_v59 = vadd.f32 %v902_v57, %v1872_v27 }
 0x297   : >> { %v809_v42 = vpop.f32.mrf.mxu3 }
 0x298   : >> { %950 = vst [vmem:[%s1603_s24] sm:$0xff] %v934_v59  ;;  %v810_v13 = vadd.f32 %v2061_v40, %v809_v42  ;;  %v878_v42 = vmul.f32 0.9, %v1932_v28 }
 0x29a   : >> { %v887_v35 = vmul.f32 0.1, %v810_v13 }
 0x29c   : >> { %v903_v5 = vadd.f32 %v887_v35, %v871_v61 }
 0x29e   : >> { %919 = vst [vmem:[#allocation2] sm:$0xff] %v903_v5  ;;  %v935_v6 = vadd.f32 %v903_v5, %v1880_v43  ;;  %v879_v5 = vmul.f32 0.9, %v1940_v46 }
 0x29f   : >> { %v812_v47 = vpop.f32.mrf.mxu3 }
 0x2a0   : >> { %951 = vst [vmem:[%s1603_s24 + $0x8] sm:$0xff] %v935_v6  ;;  %v813_v25 = vadd.f32 %v2061_v40, %v812_v47 }
 0x2a2   : >> { %v888_v27 = vmul.f32 0.1, %v813_v25 }
 0x2a4   : >> { %v904_v37 = vadd.f32 %v888_v27, %v872_v36  ;;  %v880_v36 = vmul.f32 0.9, %v1948_v34 }
 0x2a6   : >> { %920 = vst [vmem:[#allocation2 + $0x58] sm:$0xff] %v904_v37  ;;  %v936_v63 = vadd.f32 %v904_v37, %v1888_v50 }
 0x2a7   : >> { %v815_v15 = vpop.f32.mrf.mxu3 }
 0x2a8   : >> { %952 = vst [vmem:[%s1603_s24 + $0x10] sm:$0xff] %v936_v63  ;;  %v816_v31 = vadd.f32 %v2061_v40, %v815_v15  ;;  %v881_v15 = vmul.f32 0.9, %v1968_v7 }
 0x2aa   : >> { %v889_v43 = vmul.f32 0.1, %v816_v31 }
 0x2ac   : >> { %v905_v17 = vadd.f32 %v889_v43, %v873_v19 }
 0x2ae   : >> { %921 = vst [vmem:[#allocation2 + $0x18] sm:$0xff] %v905_v17  ;;  %v937_v52 = vadd.f32 %v905_v17, %v1896_v58  ;;  %v882_v17 = vmul.f32 0.9, %v1991_v38 }
 0x2af   : >> { %v818_v18 = vpop.f32.mrf.mxu3 }
 0x2b0   : >> { %953 = vst [vmem:[%s1603_s24 + $0x18] sm:$0xff] %v937_v52  ;;  %v819_v48 = vadd.f32 %v2061_v40, %v818_v18 }
 0x2b2   : >> { %v890_v50 = vmul.f32 0.1, %v819_v48 }
 0x2b4   : >> { %v906_v0 = vadd.f32 %v890_v50, %v874_v20  ;;  %v883_v20 = vmul.f32 0.9, %v2008_v56 }
 0x2b6   : >> { %922 = vst [vmem:[#allocation2 + $0x50] sm:$0xff] %v906_v0  ;;  %v938_v22 = vadd.f32 %v906_v0, %v1904_v4 }
 0x2b7   : >> { %v821_v24 = vpop.f32.mrf.mxu3 }
 0x2b8   : >> { %954 = vst [vmem:[%s1603_s24 + $0x20] sm:$0xff] %v938_v22  ;;  %v822_v55 = vadd.f32 %v2061_v40, %v821_v24  ;;  %v884_v24 = vmul.f32 0.9, %v2028_v62 }
 0x2ba   : >> { %v891_v58 = vmul.f32 0.1, %v822_v55 }
 0x2bc   : >> { %v907_v39 = vadd.f32 %v891_v58, %v875_v1 }
 0x2be   : >> { %923 = vst [vmem:[#allocation2 + $0x68] sm:$0xff] %v907_v39  ;;  %v939_v29 = vadd.f32 %v907_v39, %v1912_v10  ;;  %v885_v39 = vmul.f32 0.9, %v2036_v9 }
 0x2bf   : >> { %v824_v32 = vpop.f32.mrf.mxu3 }
 0x2c0   : >> { %955 = vst [vmem:[%s1603_s24 + $0x28] sm:$0xff] %v939_v29  ;;  %v825_v2 = vadd.f32 %v2061_v40, %v824_v32 }
 0x2c2   : >> { %v892_v4 = vmul.f32 0.1, %v825_v2 }
 0x2c4   : >> { %v908_v45 = vadd.f32 %v892_v4, %v876_v44 }
 0x2c6   : >> { %924 = vst [vmem:[#allocation2 + $0x8] sm:$0xff] %v908_v45  ;;  %v940_v33 = vadd.f32 %v908_v45, %v1920_v16 }
 0x2c7   : >> { %v827_v53 = vpop.f32.mrf.mxu3 }
 0x2c8   : >> { %956 = vst [vmem:[%s1603_s24 + $0x30] sm:$0xff] %v940_v33  ;;  %v828_v8 = vadd.f32 %v2061_v40, %v827_v53 }
 0x2ca   : >> { %v893_v10 = vmul.f32 0.1, %v828_v8 }
 0x2cc   : >> { %v909_v41 = vadd.f32 %v893_v10, %v877_v54 }
 0x2ce   : >> { %925 = vst [vmem:[#allocation2 + $0x48] sm:$0xff] %v909_v41  ;;  %v941_v57 = vadd.f32 %v909_v41, %v1928_v23 }
 0x2cf   : >> { %v830_v59 = vpop.f32.mrf.mxu3 }
 0x2d0   : >> { %957 = vst [vmem:[%s1603_s24 + $0x38] sm:$0xff] %v941_v57  ;;  %v831_v14 = vadd.f32 %v2061_v40, %v830_v59 }
 0x2d2   : >> { %v894_v16 = vmul.f32 0.1, %v831_v14 }
 0x2d4   : >> { %v910_v13 = vadd.f32 %v894_v16, %v878_v42 }
 0x2d6   : >> { %926 = vst [vmem:[#allocation2 + $0x40] sm:$0xff] %v910_v13  ;;  %v942_v61 = vadd.f32 %v910_v13, %v1936_v30 }
 0x2d7   : >> { %v833_v35 = vpop.f32.mrf.mxu3 }
 0x2d8   : >> { %958 = vst [vmem:[%s1603_s24 + $0x40] sm:$0xff] %v942_v61  ;;  %v834_v21 = vadd.f32 %v2061_v40, %v833_v35 }
 0x2da   : >> { %v895_v23 = vmul.f32 0.1, %v834_v21 }
 0x2dc   : >> { %v911_v6 = vadd.f32 %v895_v23, %v879_v5 }
 0x2de   : >> { %927 = vst [vmem:[#allocation2 + $0x20] sm:$0xff] %v911_v6  ;;  %v943_v47 = vadd.f32 %v911_v6, %v1944_v49 }
 0x2df   : >> { %v836_v25 = vpop.f32.mrf.mxu3 }
 0x2e0   : >> { %959 = vst [vmem:[%s1603_s24 + $0x48] sm:$0xff] %v943_v47  ;;  %v837_v28 = vadd.f32 %v2061_v40, %v836_v25 }
 0x2e2   : >> { %v896_v30 = vmul.f32 0.1, %v837_v28 }
 0x2e4   : >> { %v912_v27 = vadd.f32 %v896_v30, %v880_v36 }
 0x2e6   : >> { %928 = vst [vmem:[#allocation2 + $0x10] sm:$0xff] %v912_v27  ;;  %v944_v37 = vadd.f32 %v912_v27, %v1955_v60 }
 0x2e7   : >> { %v839_v63 = vpop.f32.mrf.mxu3 }
 0x2e8   : >> { %960 = vst [vmem:[%s1603_s24 + $0x50] sm:$0xff] %v944_v37  ;;  %v840_v46 = vadd.f32 %v2061_v40, %v839_v63 }
 0x2ea   : >> { %v897_v49 = vmul.f32 0.1, %v840_v46 }
 0x2ec   : >> { %v913_v31 = vadd.f32 %v897_v49, %v881_v15 }
 0x2ee   : >> { %929 = vst [vmem:[#allocation2 + $0x38] sm:$0xff] %v913_v31  ;;  %v945_v19 = vadd.f32 %v913_v31, %v1975_v11 }
 0x2ef   : >> { %v842_v43 = vpop.f32.mrf.mxu3 }
 0x2f0   : >> { %961 = vst [vmem:[%s1603_s24 + $0x58] sm:$0xff] %v945_v19  ;;  %v843_v34 = vadd.f32 %v2061_v40, %v842_v43 }
 0x2f2   : >> { %v898_v60 = vmul.f32 0.1, %v843_v34 }
 0x2f4   : >> { %v914_v52 = vadd.f32 %v898_v60, %v882_v17 }
 0x2f6   : >> { %930 = vst [vmem:[#allocation2 + $0x60] sm:$0xff] %v914_v52  ;;  %v946_v18 = vadd.f32 %v914_v52, %v1998_v26 }
 0x2f7   : >> { %v845_v48 = vpop.f32.mrf.mxu3 }
 0x2f8   : >> { %962 = vst [vmem:[%s1603_s24 + $0x60] sm:$0xff] %v946_v18  ;;  %v846_v7 = vadd.f32 %v2061_v40, %v845_v48 }
 0x2fa   : >> { %v899_v11 = vmul.f32 0.1, %v846_v7 }
 0x2fc   : >> { %v915_v50 = vadd.f32 %v899_v11, %v883_v20 }
 0x2fe   : >> { %931 = vst [vmem:[#allocation2 + $0x70] sm:$0xff] %v915_v50  ;;  %v947_v0 = vadd.f32 %v915_v50, %v2015_v51 }
 0x2ff   : >> { %v848_v22 = vpop.f32.mrf.mxu3 }
 0x300   : >> { %963 = vst [vmem:[%s1603_s24 + $0x68] sm:$0xff] %v947_v0  ;;  %v849_v38 = vadd.f32 %v2061_v40, %v848_v22 }
 0x302   : >> { %v900_v26 = vmul.f32 0.1, %v849_v38 }
 0x304   : >> { %v916_v55 = vadd.f32 %v900_v26, %v884_v24 }
 0x306   : >> { %932 = vst [vmem:[#allocation2 + $0x78] sm:$0xff] %v916_v55  ;;  %v948_v1 = vadd.f32 %v916_v55, %v2032_v3 }
 0x307   : >> { %v851_v58 = vpop.f32.mrf.mxu3 }
 0x308   : >> { %964 = vst [vmem:[%s1603_s24 + $0x70] sm:$0xff] %v948_v1  ;;  %v852_v56 = vadd.f32 %v2061_v40, %v851_v58 }
 0x30a   : >> { %v901_v29 = vmul.f32 0.1, %v852_v56 }
 0x30c   : >> { %v917_v51 = vadd.f32 %v901_v29, %v885_v39  ;;  %332 = sbr.rel (!%p330_p1) target bundleno = 82 (0x52), region = 104 }
 0x30e   : >> { %933 = vst [vmem:[#allocation2 + $0x28] sm:$0xff] %v917_v51  ;;  %v949_v32 = vadd.f32 %v917_v51, %v2040_v12 }
 0x310   : >> { %965 = vst [vmem:[%s1603_s24 + $0x78] sm:$0xff] %v949_v32 }
 0x311   : > { %1398 = shalt.err (!%p1395_p12)
}
 0x312   : > { %s1458_s8 = smov 128   ;;  %s1459_s24 = smov 8  }
 0x313   : > { %1141 = dma.vmem_to_hbm [thread:$0]  (%p1556_p3), %s980_s11, 2048, %s982_s12, %s967_s27, %s1458_s8, %s1458_s8, %s1459_s24  }
 0x314 PF: > { %s996_s16 = sand.u32 1, %s1433_s18   ;;  %p2175_p13 = scmp.ge.s32.totalorder %s1445_s21, 2 }
 0x315   : > { %s997_s13 = scalar_lea.sflag [#allocation5], %s996_s16 }
 0x316   : > { %p1155_p0 = pnand %p2175_p13, %p1525_p6 }
 0x318   : > { %p1156_p5 = pneg %p1155_p0 }
 0x31a   : > { %1428 = dma.done.wait (%p1156_p5), %s997_s13, 2048  }
 0x31b   : > { %1430 = vsyncadd (%p1156_p5), %s997_s13, 4294965248  ;;  %p19_p7 = scmp.ge.s32.totalorder %s1546_s14, 4   ;;  %s2176_s18 = smov %s1437_s19 }
 0x31c   : > { %s2177_s19 = smov %s1441_s20  ;;  %s2178_s20 = smov %s1562_s23 }
 0x31d   : > { %s2179_s21 = smov %s1546_s14  ;;  %21 = sbr.rel (!%p19_p7) target bundleno = 6 (0x6), region = 115 }
 0x322   :  { %1003 = vsyncpa [#allocation4], 1 }
 0x323   :  { %1005 = vsyncpa [#allocation4 + $0x1], 1 }
 0x324   :  { %1006 = vsyncpa [#allocation7], 1 }
 0x325   :  { %1007 = vsyncpa [#allocation5], 1 }
 0x326   :  { %1009 = vsyncpa [#allocation5 + $0x1], 1 }

</bundles_post_ra>
